<compile_context>
chip_gen: v7x
topology: tpu7x:2x2x1
jax: 0.10.0
libtpu: 0.0.40
codegen_flags: <defaults>
</compile_context>

<pallas_src>
import jax
import jax.numpy as jnp
from jax.experimental import pallas as pl
from jax.experimental.pallas import tpu as pltpu


_VMEM_LIMIT_BYTES = 48 * 1024 * 1024  # < 64 MiB v7x physical, ample on v5e/v6e


class ModuleWrapper:
    """Same semantics as the torch helper: forward(*args) == function(*args, **kwargs)."""

    def __init__(self, function, kwargs=None):
        self.function = function
        self.kwargs = kwargs if kwargs else {}

    def forward(self, *args):
        return self.function(*args, **self.kwargs)

    __call__ = forward


def _round_up(x, m):
    return ((x + m - 1) // m) * m


# ---------------------------------------------------------------------------
# Pallas kernel 1: softmax along `dim` (torch.nn.functional.softmax)
# ---------------------------------------------------------------------------
def _softmax_kernel(x_ref, o_ref):
    x = x_ref[...].astype(jnp.float32)
    m = jnp.max(x, axis=-1, keepdims=True)
    e = jnp.exp(x - m)
    s = jnp.sum(e, axis=-1, keepdims=True)
    # approx=True -> EUP vrcp slot (idle after the exp); keeps the VALU clear.
    o_ref[...] = (e * pl.reciprocal(s, approx=True)).astype(o_ref.dtype)


def pallas_softmax(x, dim=-1):
    ndim = x.ndim
    dim = dim % ndim
    # Skip the HBM transpose round-trip in the common dim == -1 case.
    x_last = x if dim == ndim - 1 else jnp.moveaxis(x, dim, -1)
    D = x_last.shape[-1]
    R = 1
    for s in x_last.shape[:-1]:
        R *= s
    x2 = x_last.reshape(R, D)  # row-major reshape of contiguous data: free

    # Large row tiles amortize the ~0.35us/grid-step overhead and push this
    # bandwidth-bound kernel toward the HBM roofline; cap block bytes so the
    # auto-pipelined (double-buffered in + out) working set stays small.
    itemsize = jnp.dtype(x2.dtype).itemsize
    max_rows_by_vmem = max(8, (4 * 1024 * 1024) // max(D * itemsize, 1))
    rows_tile = min(512, R, max_rows_by_vmem)
    if rows_tile != R:
        rows_tile = max(8, (rows_tile // 8) * 8)  # (8,128) sublane constraint
    # TODO(synk): if a single (8, D) row slab exceeds VMEM (huge D) this needs
    # a two-pass / online reduction over a lane-tiled D grid.
    # TODO(synk): when D < 128 stores are lane-masked; packing 128//D rows per
    # lane row would make them dense but needs an in-kernel segmented reduce.

    out2 = pl.pallas_call(
        _softmax_kernel,
        out_shape=jax.ShapeDtypeStruct((R, D), x2.dtype),
        grid=(pl.cdiv(R, rows_tile),),
        in_specs=[pl.BlockSpec((rows_tile, D), lambda r: (r, 0))],
        out_specs=pl.BlockSpec((rows_tile, D), lambda r: (r, 0)),
        compiler_params=pltpu.CompilerParams(
            dimension_semantics=("parallel",),
            vmem_limit_bytes=_VMEM_LIMIT_BYTES),
    )(x2)

    out = out2.reshape(x_last.shape)
    return out if dim == ndim - 1 else jnp.moveaxis(out, -1, dim)


# ---------------------------------------------------------------------------
# Pallas kernel 2: tiled matmul (torch.matmul for 2-D inputs)
# ---------------------------------------------------------------------------
def _matmul_kernel(a_ref, b_ref, o_ref, acc_ref):
    # k (reduction) is the innermost grid axis; acc persists across it.
    @pl.when(pl.program_id(2) == 0)
    def _():
        acc_ref[...] = jnp.zeros_like(acc_ref)

    acc_ref[...] += jnp.dot(a_ref[...], b_ref[...],
                            preferred_element_type=jnp.float32)

    @pl.when(pl.program_id(2) == pl.num_programs(2) - 1)
    def _():
        o_ref[...] = acc_ref[...].astype(o_ref.dtype)


def pallas_matmul(a, b, *, tm=None, tn=None, tk=None):
    M, K = a.shape
    K2, N = b.shape
    assert K == K2, "inner dimensions must match"

    # Adaptive tiles: as large as the problem allows, capped at 512 so the
    # double-buffered f32 working set (~7-10 MiB) fits every generation's
    # VMEM budget (v5e 16 MiB default scoped, v7x 64 MiB physical) while
    # amortizing the ~600-cycle per-grid-step overhead. tn/tk land on
    # multiples of 128 (256/512 for larger N/K), matching the MXU feed.
    if tm is None:
        tm = min(512, _round_up(M, 8))
    if tn is None:
        tn = min(512, _round_up(N, 128))
    if tk is None:
        tk = min(512, _round_up(K, 128))

    # Zero-pad to tile multiples: exact results for non-divisible shapes
    # (zero K-padding contributes nothing to the accumulation).
    Mp, Kp, Np = _round_up(M, tm), _round_up(K, tk), _round_up(N, tn)
    a_p = a if (Mp == M and Kp == K) else jnp.pad(a, ((0, Mp - M), (0, Kp - K)))
    b_p = b if (Kp == K and Np == N) else jnp.pad(b, ((0, Kp - K), (0, Np - N)))

    # TODO(synk): bf16-capable callers should feed bf16 operands (f32 accum)
    # to double MXU throughput and halve HBM/VMEM traffic, esp. on v7x.
    out = pl.pallas_call(
        _matmul_kernel,
        out_shape=jax.ShapeDtypeStruct((Mp, Np), a.dtype),
        grid_spec=pltpu.PrefetchScalarGridSpec(
            num_scalar_prefetch=0,
            grid=(Mp // tm, Np // tn, Kp // tk),
            in_specs=[
                pl.BlockSpec((tm, tk), lambda i, j, k: (i, k)),
                pl.BlockSpec((tk, tn), lambda i, j, k: (k, j)),
            ],
            out_specs=pl.BlockSpec((tm, tn), lambda i, j, k: (i, j)),
            scratch_shapes=[pltpu.VMEM((tm, tn), jnp.float32)],
        ),
        compiler_params=pltpu.CompilerParams(
            dimension_semantics=("parallel", "parallel", "arbitrary"),
            vmem_limit_bytes=_VMEM_LIMIT_BYTES),
    )(a_p, b_p)

    return out if (Mp == M and Np == N) else out[:M, :N]


if __name__ == "__main__":
    key = jax.random.PRNGKey(0)
    k1, k2, k3 = jax.random.split(key, 3)

    # --- ModuleWrapper around softmax (functional api with kwargs) ----------
    # D=128 keeps the demo's output stores lane-dense.
    x = jax.random.normal(k1, (2, 8, 128), dtype=jnp.float32)
    softmax_module = ModuleWrapper(pallas_softmax, kwargs={"dim": -1})
    y = softmax_module(x)
    jax.block_until_ready(y)
    y_ref = jax.nn.softmax(x, axis=-1)
    assert jnp.allclose(y, y_ref, atol=2e-3, rtol=2e-3)

    # non-last reduction axis exercises the moveaxis path
    y2 = ModuleWrapper(pallas_softmax, kwargs={"dim": 1})(x)
    jax.block_until_ready(y2)
    assert jnp.allclose(y2, jax.nn.softmax(x, axis=1), atol=2e-3, rtol=2e-3)

    # --- ModuleWrapper around matmul (functional api, positional args) ------
    # Non-tile-multiple shapes exercise the zero-padding correctness path.
    a = jax.random.normal(k2, (96, 200), dtype=jnp.float32)
    b = jax.random.normal(k3, (200, 160), dtype=jnp.float32)
    matmul_module = ModuleWrapper(pallas_matmul)
    c = matmul_module(a, b)
    jax.block_until_ready(c)
    c_ref = a @ b
    assert jnp.allclose(c, c_ref, atol=1e-3, rtol=1e-3)

    print("KERNEL_OK")
</pallas_src>

<mosaic_0001>
module attributes {stable_mosaic.version = 11 : i64} {
  func.func @_softmax_kernel(%arg0: i32, %arg1: memref<16x128xf32, #tpu.memory_space<vmem>>, %arg2: memref<16x128xf32, #tpu.memory_space<vmem>>) attributes {dimension_semantics = [#tpu.dimension_semantics<parallel>], iteration_bounds = array<i64: 1>, scalar_prefetch = 0 : i64, scratch_operands = 0 : i64, tpu.core_type = #tpu.core_type<tc>, window_params = [{transform_indices = @transform_0, window_bounds = array<i64: 16, 128>}, {transform_indices = @transform_1, window_bounds = array<i64: 16, 128>}]} {
    %c0 = arith.constant 0 : index
    %c0_0 = arith.constant 0 : index
    %0 = vector.load %arg1[%c0, %c0_0] : memref<16x128xf32, #tpu.memory_space<vmem>>, vector<16x128xf32>
    %cst = arith.constant dense<0xFF800000> : vector<16xf32>
    %1 = vector.multi_reduction <maximumf>, %0, %cst [1] : vector<16x128xf32> to vector<16xf32>
    %2 = vector.shape_cast %1 : vector<16xf32> to vector<16x1xf32>
    %3 = vector.broadcast %2 : vector<16x1xf32> to vector<16x128xf32>
    %4 = arith.subf %0, %3 : vector<16x128xf32>
    %5 = math.exp %4 : vector<16x128xf32>
    %cst_1 = arith.constant dense<0.000000e+00> : vector<16xf32>
    %6 = vector.multi_reduction <add>, %5, %cst_1 [1] : vector<16x128xf32> to vector<16xf32>
    %7 = vector.shape_cast %6 : vector<16xf32> to vector<16x1xf32>
    %8 = tpu.reciprocal %7 {approx = true} : vector<16x1xf32> -> vector<16x1xf32>
    %9 = vector.broadcast %8 : vector<16x1xf32> to vector<16x128xf32>
    %10 = arith.mulf %5, %9 : vector<16x128xf32>
    %c0_2 = arith.constant 0 : index
    %c0_3 = arith.constant 0 : index
    %11 = vector.load %arg2[%c0_2, %c0_3] : memref<16x128xf32, #tpu.memory_space<vmem>>, vector<16x128xf32>
    tpu.vector_store %arg2[%c0_2, %c0_3], %10 {strides = array<i32>} : memref<16x128xf32, #tpu.memory_space<vmem>>, vector<16x128xf32>,
    return
  }
  func.func @transform_0(%arg0: i32) -> (i32, i32) {
    %c0_i32 = arith.constant 0 : i32
    %c0_i32_0 = arith.constant 0 : i32
    return %arg0, %c0_i32 : i32, i32
  }
  func.func @transform_1(%arg0: i32) -> (i32, i32) {
    %c0_i32 = arith.constant 0 : i32
    %c0_i32_0 = arith.constant 0 : i32
    return %arg0, %c0_i32 : i32, i32
  }
}

</mosaic_0001>

<bundles_post_ra>
// kernel: tpu_custom_call.1
= control target key start
LH: loop header
LB: loop body
LE: loop exit
PB: predicated region body
PF: predicated region fallthrough
CT: control target
= control target key end

     0   :  { %6 = vsyncpa [#allocation3], 0  ;;  %s166_s0 = inlined_call_operand.hbm [shape: f32[16,128], index: 0, kind: input, shape index: {}]   ;;  %s167_s1 = inlined_call_operand.hbm [shape: f32[16,128], index: 1, kind: output, shape index: {}]  }
   0x1   :  { %7 = vsyncpa [#allocation4], 0  ;;  %s122_s6 = smov [#allocation2]   ;;  %s74_s10 = scalar_lea.hbm %s166_s0, 256 }
   0x2   :  { %s13_s7 = sshll.u32 %s122_s6, 4  ;;  %p75_p0 = scmp.ne.s32.totalorder %s166_s0, %s74_s10  ;;  %s14_s7 = int_to_ptr.vmem [resolvable:$true] %s13_s7 }
   0x3   :  { %p78_p1 = scmp.lt.u32.totalorder %s74_s10, %s166_s0 }
   0x5   :  { %p80_p2 = pnand %p78_p1, %p75_p0 }
   0x7   :  { %83 = shalt.err (!%p80_p2)
}
   0x8   :  { %s84_s15 = scalar_lea.vmem %s14_s7, 256  ;;  %p89_p4 = scmp.lt.s32.totalorder %s14_s7, %s14_s7 }
   0x9   :  { %p85_p3 = scmp.ne.s32.totalorder %s14_s7, %s84_s15  ;;  %p90_p5 = scmp.lt.s32.totalorder %s84_s15, %s84_s15 }
   0xb   :  { %p91_p6 = por %p90_p5, %p89_p4 }
   0xd   :  { %p92_p7 = pnand %p91_p6, %p85_p3 }
   0xf   :  { %95 = shalt.err (!%p92_p7)
}
  0x10   :  { %s123_s16 = smov 128   ;;  %s124_s17 = smov 8  }
  0x11   :  { %19 = dma.hbm_to_vmem [thread:$0]  %s166_s0, 256, %s14_s7, [#allocation3], %s123_s16, %s123_s16, %s124_s17  }
  0x12   :  { %118 = dma.done.wait [#allocation3], 256  }
  0x13   :  { %119 = vsyncadd [#allocation3], 4294967040  ;;  %v23_v0 = vld [vmem:[#allocation2] sm:$0xff]  ;;  %v24_v1 = vld [vmem:[#allocation2 + $0x8] sm:$0xff]  ;;  %s125_s0 = smov [#allocation5]  }
  0x14   :  { %25 = vmax.xlane.f32.xlu0 %v23_v0  ;;  %s50_s20 = sshll.u32 %s125_s0, 4  ;;  %s51_s20 = int_to_ptr.vmem [resolvable:$true] %s50_s20 }
  0x15   :  { %s96_s21 = scalar_lea.vmem %s51_s20, 256  ;;  %p101_p9 = scmp.lt.s32.totalorder %s51_s20, %s51_s20 }
  0x16   :  { %p97_p8 = scmp.ne.s32.totalorder %s51_s20, %s96_s21  ;;  %p102_p10 = scmp.lt.s32.totalorder %s96_s21, %s96_s21 }
  0x18   :  { %27 = vmax.xlane.f32.xlu0 %v24_v1  ;;  %p103_p11 = por %p102_p10, %p101_p9 }
  0x1a   :  { %p104_p12 = pnand %p103_p11, %p97_p8 }
  0xa1   :  { %v26_v2 = vpop.xlane.xlu0 %25 }
  0xa2   :  { %v29_v3 = vsub.f32 %v23_v0, %v26_v2 }
  0xa4   :  { %v31_v4 = vmul.f32 1.442695, %v29_v3 }
  0xa5   :  { %v28_v5 = vpop.xlane.xlu0 %27 }
  0xa6   :  { %66 = vpow2.f32 %v31_v4  ;;  %v30_v6 = vsub.f32 %v24_v1, %v28_v5 }
  0xa8   :  { %v33_v7 = vmul.f32 1.442695, %v30_v6 }
  0xaa   :  { %68 = vpow2.f32 %v33_v7 }
  0xb0   :  { %v67_v8 = vpop.eup %66 }
  0xb1   :  { %35 = vadd.xlane.f32.xlu1 %v67_v8 }
  0xb4   :  { %v69_v9 = vpop.eup %68 }
  0xb5   :  { %37 = vadd.xlane.f32.xlu1 %v69_v9 }
 0x13e   :  { %v36_v10 = vpop.xlane.xlu1 %35 }
 0x13f   :  { %70 = vrcp.f32 %v36_v10 }
 0x142   :  { %v38_v11 = vpop.xlane.xlu1 %37 }
 0x143   :  { %72 = vrcp.f32 %v38_v11 }
 0x149   :  { %v71_v12 = vpop.eup %70 }
 0x14a   :  { %v41_v13 = vmul.f32 %v71_v12, %v67_v8 }
 0x14c   :  { %43 = vst [vmem:[#allocation5] sm:$0xff] %v41_v13 }
 0x14d   :  { %v73_v14 = vpop.eup %72 }
 0x14e   :  { %v42_v15 = vmul.f32 %v73_v14, %v69_v9 }
 0x150   :  { %44 = vst [vmem:[#allocation5 + $0x8] sm:$0xff] %v42_v15 }
 0x151   :  { %107 = shalt.err (!%p104_p12)
}
 0x152   :  { %s108_s24 = scalar_lea.hbm %s167_s1, 256 }
 0x153   :  { %p109_p13 = scmp.ne.s32.totalorder %s167_s1, %s108_s24  ;;  %p112_p0 = scmp.lt.u32.totalorder %s108_s24, %s167_s1 }
 0x155   :  { %p114_p1 = pnand %p112_p0, %p109_p13 }
 0x157   :  { %117 = shalt.err (!%p114_p1)
}
 0x158   :  { %56 = dma.vmem_to_hbm [thread:$0]  %s51_s20, 256, %s167_s1, [#allocation4], %s123_s16, %s123_s16, %s124_s17  }
 0x159   :  { %120 = dma.done.wait [#allocation4], 256  }
 0x15a   :  { %121 = vsyncadd [#allocation4], 4294967040 }
 0x15b   :  { %60 = vsyncpa [#allocation3], 1 }
 0x15c   :  { %61 = vsyncpa [#allocation4], 1 }

</bundles_post_ra>
